<compile_context>
chip_gen: v5e
topology: v5e:2x2
jax: 0.10.0
libtpu: 0.0.40
codegen_flags: <defaults>
</compile_context>

<pallas_src>
import numpy as np

import jax
import jax.numpy as jnp
from jax import lax
from jax.experimental import pallas as pl
from jax.experimental.pallas import tpu as pltpu


def _round_up(x, m):
    return (x + m - 1) // m * m


def _choose_tile(total, candidates=(1024, 512, 256, 128)):
    """Largest lane-dense tile that divides `total` and leaves >=2 grid steps."""
    for t in candidates:
        if total % t == 0 and total // t >= 2:
            return t
    return total


# ----------------------------------------------------------------------------
# Pallas kernels
# ----------------------------------------------------------------------------
def conv_relu_pool_kernel(p_ref, wt_ref, b_ref, o_ref):
    """Fused Conv2d('same') + ReLU + MaxPool2d(2,2), flipped (Cout, HW) layout.

    p_ref : (1, 4, KKC, T)  bf16 im2col patches; axis 1 enumerates the 2x2
                            pool-window offsets, lanes = pooled-pixel tile.
    wt_ref: (Cout, KKC)     bf16, W^T with columns ordered (kh, kw, cin).
    b_ref : (Cout, 1)       f32 bias.
    o_ref : (1, Cout, T)    f32 pooled activations.
    """
    wt = wt_ref[...]
    acc = jnp.dot(wt, p_ref[0, 0], preferred_element_type=jnp.float32)
    for p in range(1, 4):  # unrolled over the 2x2 pool-window offsets
        acc = jnp.maximum(
            acc, jnp.dot(wt, p_ref[0, p], preferred_element_type=jnp.float32))
    # Bias hoisted out of the pool loop; ReLU and max commute.
    o_ref[0] = jnp.maximum(acc + b_ref[...], 0.0)


def mlp_kernel(x_ref, w1_ref, b1_ref, w2_ref, b2_ref, o_ref, acc_ref):
    """Classifier: Linear -> ReLU -> (Dropout, eval identity) -> Linear.

    The Din contraction is tiled over grid axis 0; acc_ref holds the first
    layer's pre-activation in f32 across grid steps.
    """
    k = pl.program_id(0)

    @pl.when(k == 0)
    def _():
        acc_ref[...] = jnp.zeros_like(acc_ref)

    acc_ref[...] += jnp.dot(x_ref[...], w1_ref[...],
                            preferred_element_type=jnp.float32)

    @pl.when(k == pl.num_programs(0) - 1)
    def _():
        h = jnp.maximum(acc_ref[...] + b1_ref[...], 0.0)
        o_ref[...] = (
            jnp.dot(h.astype(w2_ref.dtype), w2_ref[...],
                    preferred_element_type=jnp.float32) + b2_ref[...])


# ----------------------------------------------------------------------------
# pallas_call wrappers
# ----------------------------------------------------------------------------
def conv_relu_pool(patches, w_t, bias):
    """patches (N,4,KKC,HW) bf16, w_t (Cout,KKC) bf16, bias (Cout,1) f32."""
    N, _, KKC, HW = patches.shape
    Cout = w_t.shape[0]
    HWp = _round_up(HW, 128)
    if HWp != HW:  # lane-pad pooled pixels; padded columns are sliced off below
        patches = jnp.pad(patches, ((0, 0), (0, 0), (0, 0), (0, HWp - HW)))
    T = _choose_tile(HWp)
    out = pl.pallas_call(
        conv_relu_pool_kernel,
        out_shape=jax.ShapeDtypeStruct((N, Cout, HWp), jnp.float32),
        grid=(N, HWp // T),
        in_specs=[
            pl.BlockSpec((1, 4, KKC, T), lambda n, t: (n, 0, 0, t)),
            pl.BlockSpec((Cout, KKC), lambda n, t: (0, 0)),
            pl.BlockSpec((Cout, 1), lambda n, t: (0, 0)),
        ],
        out_specs=pl.BlockSpec((1, Cout, T), lambda n, t: (n, 0, t)),
        compiler_params=pltpu.CompilerParams(
            dimension_semantics=("parallel", "parallel"),
            vmem_limit_bytes=32 * 1024 * 1024),
    )(patches, w_t, bias)
    return out[:, :, :HW]


def classifier(feat, w1, b1, w2, b2, num_classes):
    """feat (N,Din) bf16; w1 (Din,Fp) bf16; b1 (1,Fp) f32; w2 (Fp,Cp) bf16; b2 (1,Cp) f32."""
    N, Din = feat.shape
    Fp = w1.shape[1]
    Cp = w2.shape[1]
    Dt = _choose_tile(Din, candidates=(2048, 1024, 512, 256, 128))
    out = pl.pallas_call(
        mlp_kernel,
        out_shape=jax.ShapeDtypeStruct((N, Cp), jnp.float32),
        grid=(Din // Dt,),
        in_specs=[
            pl.BlockSpec((N, Dt), lambda k: (0, k)),
            pl.BlockSpec((Dt, Fp), lambda k: (k, 0)),
            pl.BlockSpec((1, Fp), lambda k: (0, 0)),
            pl.BlockSpec((Fp, Cp), lambda k: (0, 0)),
            pl.BlockSpec((1, Cp), lambda k: (0, 0)),
        ],
        out_specs=pl.BlockSpec((N, Cp), lambda k: (0, 0)),
        scratch_shapes=[pltpu.VMEM((N, Fp), jnp.float32)],
        compiler_params=pltpu.CompilerParams(
            dimension_semantics=("arbitrary",),
            vmem_limit_bytes=32 * 1024 * 1024),
    )(feat, w1, b1, w2, b2)
    return out[:, :num_classes]


# ----------------------------------------------------------------------------
# Glue: im2col / layout plumbing (plain JAX)
# ----------------------------------------------------------------------------
def im2col_pool_patches(x_nchw, k):
    """NCHW -> (N, 4, k*k*C, (H//2)*(W//2)) bf16 pool-offset im2col patches."""
    N, C, H, W = x_nchw.shape
    pad = k // 2  # matches torch padding=k//2 ('same' for odd k)
    xp = jnp.pad(x_nchw, ((0, 0), (0, 0), (pad, pad), (pad, pad)))
    shifts = [xp[:, :, kh:kh + H, kw:kw + W]
              for kh in range(k) for kw in range(k)]
    full = jnp.concatenate(shifts, axis=1)            # (N, k*k*C, H, W)
    Hp, Wp = H // 2, W // 2
    offs = [full[:, :, 0::2, 0::2], full[:, :, 0::2, 1::2],
            full[:, :, 1::2, 0::2], full[:, :, 1::2, 1::2]]
    patches = jnp.stack(offs, axis=1)                 # (N, 4, k*k*C, Hp, Wp)
    patches = patches.reshape(N, 4, k * k * C, Hp * Wp)
    return patches.astype(jnp.bfloat16), Hp, Wp


def run_stream(x_nchw, stream_params):
    """One CNN stream: repeated (Conv + ReLU + MaxPool). Returns torch-order flat features."""
    x = x_nchw.astype(jnp.float32)
    N = x.shape[0]
    for layer in stream_params:
        patches, Hp, Wp = im2col_pool_patches(x, layer["k"])
        y = conv_relu_pool(patches, layer["w_t"], layer["b"])   # (N, Cout, Hp*Wp)
        x = y.reshape(N, layer["cout"], Hp, Wp)                 # NCHW directly
    return x.reshape(N, -1)


def flexible_fire_cnn_forward(rgb, thermal, params):
    rgb_feat = run_stream(rgb, params["rgb"])
    th_feat = run_stream(thermal, params["thermal"])
    combined = jnp.concatenate([rgb_feat, th_feat], axis=1).astype(jnp.bfloat16)
    return classifier(combined, params["w1"], params["b1"],
                      params["w2"], params["b2"], params["num_classes"])


# ----------------------------------------------------------------------------
# Deterministic parameter initialization (shapes follow the nn.Module __init__)
# ----------------------------------------------------------------------------
def make_stream_params(key, in_channels, architecture):
    layers, raw = [], []
    for i in range(architecture["num_layers"]):
        cout = architecture["num_filters"][i]
        k = architecture["filter_sizes"][i]
        key, kw_key, kb_key = jax.random.split(key, 3)
        # torch layout (Cout, Cin, K, K)
        w = 0.1 * jax.random.normal(kw_key, (cout, in_channels, k, k), jnp.float32)
        b = 0.1 * jax.random.normal(kb_key, (cout,), jnp.float32)
        # W^T (Cout, k*k*Cin) with columns ordered (kh, kw, cin) = im2col rows.
        w_t = jnp.transpose(w, (0, 2, 3, 1)).reshape(cout, k * k * in_channels)
        layers.append({"w_t": w_t.astype(jnp.bfloat16),
                       "b": b.reshape(cout, 1),
                       "k": k, "cout": cout})
        raw.append((w, b))
        in_channels = cout
    return layers, raw, key


def make_params(architecture, num_classes, image_size):
    key = jax.random.PRNGKey(0)
    rgb_layers, rgb_raw, key = make_stream_params(key, 3, architecture)
    th_layers, th_raw, key = make_stream_params(key, 1, architecture)

    feature_size = image_size // (2 ** architecture["num_layers"])
    last_filters = architecture["num_filters"][architecture["num_layers"] - 1]
    feature_dim = feature_size * feature_size * last_filters

    fc = architecture["fc_size"]
    key, k1, k2, k3, k4 = jax.random.split(key, 5)
    w1 = 0.05 * jax.random.normal(k1, (feature_dim * 2, fc), jnp.float32)
    b1 = 0.05 * jax.random.normal(k2, (1, fc), jnp.float32)
    w2 = 0.05 * jax.random.normal(k3, (fc, num_classes), jnp.float32)
    b2 = 0.05 * jax.random.normal(k4, (1, num_classes), jnp.float32)

    # Lane-pad fc_size / num_classes to 128 so classifier loads/stores are
    # lane-dense; padded rows/cols are zero and sliced off after the kernel.
    Fp = _round_up(fc, 128)
    Cp = _round_up(num_classes, 128)
    params = {
        "rgb": rgb_layers,
        "thermal": th_layers,
        "w1": jnp.pad(w1, ((0, 0), (0, Fp - fc))).astype(jnp.bfloat16),
        "b1": jnp.pad(b1, ((0, 0), (0, Fp - fc))),
        "w2": jnp.pad(w2, ((0, Fp - fc), (0, Cp - num_classes))).astype(jnp.bfloat16),
        "b2": jnp.pad(b2, ((0, 0), (0, Cp - num_classes))),
        "num_classes": num_classes,
    }
    raw = {"rgb": rgb_raw, "thermal": th_raw,
           "w1": w1, "b1": b1, "w2": w2, "b2": b2}
    return params, raw


# ----------------------------------------------------------------------------
# Pure-JAX f32 reference (matches the torch module in eval mode)
# ----------------------------------------------------------------------------
def reference_forward(rgb, thermal, raw):
    def stream(x, layers):
        for (w, b) in layers:
            x = lax.conv_general_dilated(
                x, w, window_strides=(1, 1), padding="SAME",
                dimension_numbers=("NCHW", "OIHW", "NCHW"))
            x = jnp.maximum(x + b.reshape(1, -1, 1, 1), 0.0)
            x = lax.reduce_window(x, -jnp.inf, lax.max,
                                  (1, 1, 2, 2), (1, 1, 2, 2), "VALID")
        return x.reshape(x.shape[0], -1)

    rgb_feat = stream(rgb.astype(jnp.float32), raw["rgb"])
    th_feat = stream(thermal.astype(jnp.float32), raw["thermal"])
    combined = jnp.concatenate([rgb_feat, th_feat], axis=1)
    h = jnp.maximum(combined @ raw["w1"] + raw["b1"], 0.0)
    return h @ raw["w2"] + raw["b2"]


# ----------------------------------------------------------------------------
if __name__ == "__main__":
    # Small configuration (the reference module assumes 224x224; we use 32x32
    # and size the classifier consistently with the actual flattened features).
    architecture = {
        "num_layers": 2,
        "num_filters": [4, 8],
        "filter_sizes": [3, 3],
        "fc_size": 32,
    }
    num_classes = 2
    image_size = 32
    batch = 2

    params, raw = make_params(architecture, num_classes, image_size)

    key = jax.random.PRNGKey(0)
    k_rgb, k_th = jax.random.split(key)
    rgb = jax.random.normal(k_rgb, (batch, 3, image_size, image_size), jnp.float32)
    thermal = jax.random.normal(k_th, (batch, 1, image_size, image_size), jnp.float32)

    logits = flexible_fire_cnn_forward(rgb, thermal, params)
    logits = jax.block_until_ready(logits)
    assert logits.shape == (batch, num_classes)

    ref = reference_forward(rgb, thermal, raw)
    np.testing.assert_allclose(np.asarray(logits), np.asarray(ref),
                               rtol=5e-2, atol=5e-2)

    print("KERNEL_OK")
</pallas_src>

<mosaic_0001>
module attributes {stable_mosaic.version = 11 : i64} {
  func.func @conv_relu_pool_kernel(%arg0: i32, %arg1: i32, %arg2: memref<1x4x27x128xbf16, #tpu.memory_space<vmem>>, %arg3: memref<4x27xbf16, #tpu.memory_space<vmem>>, %arg4: memref<4x1xf32, #tpu.memory_space<vmem>>, %arg5: memref<1x4x128xf32, #tpu.memory_space<vmem>>) attributes {dimension_semantics = [#tpu.dimension_semantics<parallel>, #tpu.dimension_semantics<parallel>], iteration_bounds = array<i64: 2, 2>, scalar_prefetch = 0 : i64, scratch_operands = 0 : i64, tpu.core_type = #tpu.core_type<tc>, window_params = [{transform_indices = @transform_0, window_bounds = array<i64: 1, 4, 27, 128>}, {pipeline_mode = #tpu.pipeline_mode<synchronous>, transform_indices = @transform_1, window_bounds = array<i64: 4, 27>}, {pipeline_mode = #tpu.pipeline_mode<synchronous>, transform_indices = @transform_2, window_bounds = array<i64: 4, 1>}, {transform_indices = @transform_3, window_bounds = array<i64: 1, 4, 128>}]} {
    %c0 = arith.constant 0 : index
    %c0_0 = arith.constant 0 : index
    %0 = vector.load %arg3[%c0, %c0_0] : memref<4x27xbf16, #tpu.memory_space<vmem>>, vector<4x27xbf16>
    %c0_1 = arith.constant 0 : index
    %c0_2 = arith.constant 0 : index
    %c0_3 = arith.constant 0 : index
    %c0_4 = arith.constant 0 : index
    %1 = vector.load %arg2[%c0_1, %c0_2, %c0_3, %c0_4] : memref<1x4x27x128xbf16, #tpu.memory_space<vmem>>, vector<1x1x27x128xbf16>
    %2 = vector.shape_cast %1 : vector<1x1x27x128xbf16> to vector<27x128xbf16>
    %cst = arith.constant dense<0.000000e+00> : vector<4x128xf32>
    %3 = tpu.matmul %0, %2, %cst {dimension_numbers = #tpu.dot_dimension_numbers<[1], [0], [0], [1], [0, 0, 1, 1], [], []>} : vector<4x27xbf16>, vector<27x128xbf16>, vector<4x128xf32> -> vector<4x128xf32>
    %c0_5 = arith.constant 0 : index
    %c1 = arith.constant 1 : index
    %c0_6 = arith.constant 0 : index
    %c0_7 = arith.constant 0 : index
    %4 = vector.load %arg2[%c0_5, %c1, %c0_6, %c0_7] : memref<1x4x27x128xbf16, #tpu.memory_space<vmem>>, vector<1x1x27x128xbf16>
    %5 = vector.shape_cast %4 : vector<1x1x27x128xbf16> to vector<27x128xbf16>
    %cst_8 = arith.constant dense<0.000000e+00> : vector<4x128xf32>
    %6 = tpu.matmul %0, %5, %cst_8 {dimension_numbers = #tpu.dot_dimension_numbers<[1], [0], [0], [1], [0, 0, 1, 1], [], []>} : vector<4x27xbf16>, vector<27x128xbf16>, vector<4x128xf32> -> vector<4x128xf32>
    %7 = arith.maximumf %3, %6 : vector<4x128xf32>
    %c0_9 = arith.constant 0 : index
    %c2 = arith.constant 2 : index
    %c0_10 = arith.constant 0 : index
    %c0_11 = arith.constant 0 : index
    %8 = vector.load %arg2[%c0_9, %c2, %c0_10, %c0_11] : memref<1x4x27x128xbf16, #tpu.memory_space<vmem>>, vector<1x1x27x128xbf16>
    %9 = vector.shape_cast %8 : vector<1x1x27x128xbf16> to vector<27x128xbf16>
    %cst_12 = arith.constant dense<0.000000e+00> : vector<4x128xf32>
    %10 = tpu.matmul %0, %9, %cst_12 {dimension_numbers = #tpu.dot_dimension_numbers<[1], [0], [0], [1], [0, 0, 1, 1], [], []>} : vector<4x27xbf16>, vector<27x128xbf16>, vector<4x128xf32> -> vector<4x128xf32>
    %11 = arith.maximumf %7, %10 : vector<4x128xf32>
    %c0_13 = arith.constant 0 : index
    %c3 = arith.constant 3 : index
    %c0_14 = arith.constant 0 : index
    %c0_15 = arith.constant 0 : index
    %12 = vector.load %arg2[%c0_13, %c3, %c0_14, %c0_15] : memref<1x4x27x128xbf16, #tpu.memory_space<vmem>>, vector<1x1x27x128xbf16>
    %13 = vector.shape_cast %12 : vector<1x1x27x128xbf16> to vector<27x128xbf16>
    %cst_16 = arith.constant dense<0.000000e+00> : vector<4x128xf32>
    %14 = tpu.matmul %0, %13, %cst_16 {dimension_numbers = #tpu.dot_dimension_numbers<[1], [0], [0], [1], [0, 0, 1, 1], [], []>} : vector<4x27xbf16>, vector<27x128xbf16>, vector<4x128xf32> -> vector<4x128xf32>
    %15 = arith.maximumf %11, %14 : vector<4x128xf32>
    %c0_17 = arith.constant 0 : index
    %c0_18 = arith.constant 0 : index
    %16 = vector.load %arg4[%c0_17, %c0_18] : memref<4x1xf32, #tpu.memory_space<vmem>>, vector<4x1xf32>
    %17 = vector.broadcast %16 : vector<4x1xf32> to vector<4x128xf32>
    %18 = arith.addf %15, %17 : vector<4x128xf32>
    %cst_19 = arith.constant 0.000000e+00 : f32
    %19 = vector.broadcast %cst_19 : f32 to vector<4x128xf32>
    %20 = arith.maximumf %18, %19 : vector<4x128xf32>
    %c0_20 = arith.constant 0 : index
    %c0_21 = arith.constant 0 : index
    %c0_22 = arith.constant 0 : index
    %21 = vector.load %arg5[%c0_20, %c0_21, %c0_22] : memref<1x4x128xf32, #tpu.memory_space<vmem>>, vector<1x4x128xf32>
    %22 = vector.shape_cast %21 : vector<1x4x128xf32> to vector<4x128xf32>
    %23 = vector.shape_cast %20 : vector<4x128xf32> to vector<1x4x128xf32>
    tpu.vector_store %arg5[%c0_20, %c0_21, %c0_22], %23 {strides = array<i32>} : memref<1x4x128xf32, #tpu.memory_space<vmem>>, vector<1x4x128xf32>,
    return
  }
  func.func @transform_0(%arg0: i32, %arg1: i32) -> (i32, i32, i32, i32) {
    %c0_i32 = arith.constant 0 : i32
    %c0_i32_0 = arith.constant 0 : i32
    %c0_i32_1 = arith.constant 0 : i32
    return %arg0, %c0_i32, %c0_i32_0, %arg1 : i32, i32, i32, i32
  }
  func.func @transform_1(%arg0: i32, %arg1: i32) -> (i32, i32) {
    %c0_i32 = arith.constant 0 : i32
    %c0_i32_0 = arith.constant 0 : i32
    %c0_i32_1 = arith.constant 0 : i32
    return %c0_i32, %c0_i32_0 : i32, i32
  }
  func.func @transform_2(%arg0: i32, %arg1: i32) -> (i32, i32) {
    %c0_i32 = arith.constant 0 : i32
    %c0_i32_0 = arith.constant 0 : i32
    %c0_i32_1 = arith.constant 0 : i32
    return %c0_i32, %c0_i32_0 : i32, i32
  }
  func.func @transform_3(%arg0: i32, %arg1: i32) -> (i32, i32, i32) {
    %c0_i32 = arith.constant 0 : i32
    %c0_i32_0 = arith.constant 0 : i32
    return %arg0, %c0_i32, %arg1 : i32, i32, i32
  }
}

</mosaic_0001>

<bundles_post_ra>
// kernel: tpu_custom_call.1
= control target key start
LH: loop header
LB: loop body
LE: loop exit
PB: predicated region body
PF: predicated region fallthrough
CT: control target
= control target key end

     0   :  { %8 = vsyncpa [#allocation4], 0  ;;  %s958_s0 = inlined_call_operand.vmem [shape: bf16[2,4,27,256], index: 0, kind: input, shape index: {}]   ;;  %s959_s1 = inlined_call_operand.vmem [shape: bf16[4,27], index: 1, kind: input, shape index: {}]   ;;  %s960_s2 = inlined_call_operand.vmem [shape: f32[4,1], index: 2, kind: input, shape index: {}]   ;;  %s961_s3 = inlined_call_operand.hbm [shape: f32[2,4,256], index: 3, kind: output, shape index: {}]  }
   0x1   :  { %10 = vsyncpa [#allocation4 + $0x1], 0  ;;  %s800_s12 = smov 0   ;;  %s802_s13 = smov 0  }
   0x2   :  { %s804_s14 = smov 0   ;;  %s806_s15 = smov 0  }
   0x3   :  { %s808_s16 = smov 0   ;;  %s810_s17 = smov 0  }
   0x4   :  { %s812_s18 = smov 0   ;;  %s814_s19 = smov 0  }
   0x5 LB: > { %s537_s20 = sadd.s32 4294967295, %s776_s19   ;;  %s538_s21 = sadd.s32 4294967294, %s776_s19   ;;  %s776_s19 = sphi %s814_s19, %s16_s19   ;;  %s772_s18 = sphi %s812_s18, %s971_s18   ;;  %s768_s17 = sphi %s810_s17, %s970_s17   ;;  %s764_s16 = sphi %s808_s16, %s969_s16   ;;  %s760_s15 = sphi %s806_s15, %s968_s15   ;;  %s756_s14 = sphi %s804_s14, %s967_s14   ;;  %s752_s13 = sphi %s802_s13, %s966_s13   ;;  %s748_s12 = sphi %s800_s12, %s965_s12  }
   0x6   : > { %s25_s22 = sadd.s32 1, %s768_s17  ;;  %s28_s23 = sadd.s32 1, %s772_s18 }
   0x7   : > { %p26_p0 = scmp.ge.s32.totalorder %s25_s22, 2  ;;  %p44_p1 = scmp.ne.s32.totalorder %s756_s14, %s752_s13 }
   0x8   : > { %p45_p2 = scmp.eq.s32.totalorder %s776_s19, 0  ;;  %p118_p5 = scmp.eq.s32.totalorder %s537_s20, 3 }
   0x9   : > { %s973_s22 = smov (%p26_p0, %s25_s22), 0  ;;  %s975_s23 = smov (!%p26_p0, %s28_s23), %s772_s18 }
   0xa   : > { %s33_s24 = ssub.s32 %s768_s17, %s973_s22  ;;  %p852_p3 = por %p45_p2, %p44_p1 }
   0xb   : > { %p30_p4 = scmp.ge.s32.totalorder %s975_s23, 2  ;;  %p123_p6 = scmp.ne.s32.totalorder %s752_s13, %s748_s12 }
   0xc   : > { %p124_p7 = scmp.eq.s32.totalorder %s538_s21, 3  ;;  %p860_p8 = por %p118_p5, %p44_p1 }
   0xd   : > { %s977_s23 = smov (%p30_p4, %s975_s23), 0  ;;  %s37_s30 = sadd.s32 1, %s756_s14 }
   0xe   : > { %p864_p9 = por %p124_p7, %p123_p6  ;;  %s32_s28 = ssub.s32 %s772_s18, %s977_s23 }
   0xf   : > { %s34_s29 = sor.u32 %s33_s24, %s32_s28  ;;  %p540_p11 = scmp.ge.s32.totalorder %s776_s19, 4 }
  0x10   : > { %p35_p10 = scmp.eq.s32.totalorder %s34_s29, 0 }
  0x11   : > { %146 = sbr.rel (%p540_p11) target bundleno = 44 (0x2c), region = 24 }
  0x12   : > { %s872_s4 = scalar_select %p35_p10, %s756_s14, %s37_s30  }
  0x16   : > { %149 = sbr.rel (!%p852_p3) target bundleno = 44 (0x2c), region = 28  ;;  %s151_s5 = sand.u32 (%p852_p3), 1, %s756_s14  }
  0x17   : > { %s542_s6 = sshll.u32 (%p852_p3), %s772_s18, 5  ;;  %s541_s7 = sshll.u32 (%p852_p3), %s151_s5, 6 }
  0x18   : > { %s155_s8 = sadd.s32 (%p852_p3), %s768_s17, %s542_s6  ;;  %s153_s21 = scalar_lea.vmem (%p852_p3), [#allocation2], %s541_s7 }
  0x19   : > { %s543_s9 = sshll.u32 (%p852_p3), %s155_s8, 2 }
  0x1a   : > { %s883_s20 = scalar_lea.vmem (%p852_p3), %s958_s0, %s543_s9 }
  0x1b   : > { %v174_v0 = vld [vmem:[%s883_s20] sm:$0xf]  ;;  %v176_v1 = vld [vmem:[%s883_s20 + $0x8] sm:$0xf]  ;;  %v178_v2 = vld [vmem:[%s883_s20 + $0x10] sm:$0xf] }
  0x1c   : > { %175 = vst [vmem:[%s153_s21] sm:$0xf] %v174_v0  ;;  %v180_v3 = vld [vmem:[%s883_s20 + $0x18] sm:$0xf]  ;;  %v182_v4 = vld [vmem:[%s883_s20 + $0x20] sm:$0xf] }
  0x1d   : > { %177 = vst [vmem:[%s153_s21 + $0x4] sm:$0xf] %v176_v1  ;;  %v184_v5 = vld [vmem:[%s883_s20 + $0x28] sm:$0xf]  ;;  %v186_v6 = vld [vmem:[%s883_s20 + $0x30] sm:$0xf] }
  0x1e   : > { %179 = vst [vmem:[%s153_s21 + $0x8] sm:$0xf] %v178_v2  ;;  %v188_v7 = vld [vmem:[%s883_s20 + $0x38] sm:$0xf]  ;;  %v190_v8 = vld [vmem:[%s883_s20 + $0x40] sm:$0xf] }
  0x1f   : > { %181 = vst [vmem:[%s153_s21 + $0xc] sm:$0xf] %v180_v3  ;;  %v192_v9 = vld [vmem:[%s883_s20 + $0x48] sm:$0xf]  ;;  %v194_v10 = vld [vmem:[%s883_s20 + $0x50] sm:$0xf] }
  0x20   : > { %183 = vst [vmem:[%s153_s21 + $0x10] sm:$0xf] %v182_v4  ;;  %v196_v11 = vld [vmem:[%s883_s20 + $0x58] sm:$0xf]  ;;  %v198_v12 = vld [vmem:[%s883_s20 + $0x60] sm:$0xf] }
  0x21   : > { %185 = vst [vmem:[%s153_s21 + $0x14] sm:$0xf] %v184_v5  ;;  %v200_v13 = vld [vmem:[%s883_s20 + $0x68] sm:$0xf]  ;;  %v202_v14 = vld [vmem:[%s883_s20 + $0x70] sm:$0xf] }
  0x22   : > { %187 = vst [vmem:[%s153_s21 + $0x18] sm:$0xf] %v186_v6  ;;  %v204_v15 = vld [vmem:[%s883_s20 + $0x78] sm:$0xf] }
  0x23   : > { %189 = vst [vmem:[%s153_s21 + $0x1c] sm:$0xf] %v188_v7 }
  0x24   : > { %191 = vst [vmem:[%s153_s21 + $0x20] sm:$0xf] %v190_v8 }
  0x25   : > { %193 = vst [vmem:[%s153_s21 + $0x24] sm:$0xf] %v192_v9 }
  0x26   : > { %195 = vst [vmem:[%s153_s21 + $0x28] sm:$0xf] %v194_v10 }
  0x27   : > { %197 = vst [vmem:[%s153_s21 + $0x2c] sm:$0xf] %v196_v11 }
  0x28   : > { %199 = vst [vmem:[%s153_s21 + $0x30] sm:$0xf] %v198_v12 }
  0x29   : > { %201 = vst [vmem:[%s153_s21 + $0x34] sm:$0xf] %v200_v13 }
  0x2a   : > { %203 = vst [vmem:[%s153_s21 + $0x38] sm:$0xf] %v202_v14 }
  0x2b   : > { %205 = vst [vmem:[%s153_s21 + $0x3c] sm:$0xf] %v204_v15 }
  0x2c PF: > { %p544_p12 = scmp.ge.s32.totalorder %s776_s19, 1  ;;  %p260_p13 = scmp.lt.s32.totalorder %s776_s19, 5 }
  0x2e   : > { %p261_p0 = pnand %p544_p12, %p260_p13 }
  0x2f   : > { %s904_s24 = sand.u32 (!%p261_p0), 1, %s752_s13   ;;  %s596_s7 = sshll.u32 (!%p261_p0), %s764_s16, 1 }
  0x30   : > { %264 = sbr.rel (%p261_p0) target bundleno = 211 (0xd3), region = 69  ;;  %s545_s25 = sshll.u32 (!%p261_p0), %s904_s24, 6 }
  0x31   : > { %s269_s30 = scalar_lea.vmem (!%p261_p0), [#allocation2], %s545_s25  ;;  %s450_s8 = sadd.s32 (!%p261_p0), %s760_s15, %s596_s7 }
  0x32   : > { %s546_s9 = sshll.u32 (!%p261_p0), %s904_s24, 2  ;;  %s597_s10 = sshll.u32 (!%p261_p0), %s450_s8, 2 }
  0x33   : > { %s452_s21 = scalar_lea.hbm (!%p261_p0), %s961_s3, %s597_s10  ;;  %s289_s16 = scalar_lea.vmem (!%p261_p0), [#allocation3], %s546_s9 }
  0x34   : > { %s454_s25 = sshll.u32 (!%p261_p0), %s289_s16, 4  ;;  %s456_s28 = sshll.u32 (!%p261_p0), %s452_s21, 4  ;;  %s455_s25 = int_to_ptr.vmem [resolvable:$true] %s454_s25  ;;  %s457_s28 = int_to_ptr.hbm [resolvable:$true] %s456_s28 }
  0x35   : > { %vm311_vm0 = vcmask 1044480   ;;  %vm312_vm1 = vcmask 1045504   ;;  %v778_v16 = vmov 65535   ;;  %v430_v18 = vld [vmem:[%s960_s2] sm:$0xf]  ;;  %v779_v20 = vmov 0  }
  0x36   : > { %v313_v17 = vsel %vm311_vm0, 4294967295, %v778_v16  ;;  %681 = vset.pattern.permute.xlu0 %v779_v20  ;;  %v553_v21 = vld [vmem:[%s269_s30 + $0x8] sm:$0xf]  ;;  %v601_v22 = vld [vmem:[%s269_s30 + $0x8] sm:$0x30]  ;;  %v600_v37 = vld [vmem:[%s269_s30] sm:$0xff] }
  0x37   : > { %v314_v19 = vsel %vm312_vm1, %v313_v17, 0  ;;  %v566_v23 = vld [vmem:[%s269_s30 + $0x18] sm:$0xf]  ;;  %433 = vperm.xlu0 %681, %v430_v18   ;;  %v554_v24 = vor.u32 %v601_v22, %v553_v21  ;;  %v603_v25 = vld [vmem:[%s269_s30 + $0x18] sm:$0x30]  ;;  %v602_v38 = vld [vmem:[%s269_s30 + $0x10] sm:$0xff] }
  0x38   : > { %v579_v26 = vld [vmem:[%s269_s30 + $0x28] sm:$0xf]  ;;  %v605_v27 = vld [vmem:[%s269_s30 + $0x28] sm:$0x30]  ;;  %v567_v28 = vor.u32 %v603_v25, %v566_v23  ;;  %v592_v30 = vld [vmem:[%s269_s30 + $0x38] sm:$0xf] }
  0x39   : > { %v580_v29 = vor.u32 %v605_v27, %v579_v26  ;;  %v607_v31 = vld [vmem:[%s269_s30 + $0x38] sm:$0x30]  ;;  %v316_v32 = vand.u32 %v554_v24, %v314_v19  ;;  %v604_v39 = vld [vmem:[%s269_s30 + $0x20] sm:$0xff]  ;;  %v606_v40 = vld [vmem:[%s269_s30 + $0x30] sm:$0xff]  ;;  %vm307_vm2 = vcmask 220160   ;;  %s440_s15 = scalar_lea.sflag [#allocation4], %s904_s24 }
  0x3a   : > { %v593_v33 = vor.u32 %v607_v31, %v592_v30  ;;  %v348_v34 = vand.u32 %v567_v28, %v314_v19  ;;  %v291_v41 = vld [vmem:[%s959_s1] sm:$0x3]  ;;  %s696_s29 = sshra.s32 %s457_s28, 4  ;;  %s702_s7 = scalar_lea.hbm %s961_s3, 16  ;;  %s697_s29 = int_to_ptr.hbm [resolvable:$true] %s696_s29 }
  0x3b   : > { %v381_v35 = vand.u32 %v580_v29, %v314_v19  ;;  %324 = vmatpush.bf16.msra.mxu0 %v316_v32  ;;  %s698_s30 = scalar_lea.hbm %s697_s29, 4  ;;  %p703_p4 = scmp.lt.s32.totalorder %s697_s29, %s961_s3 }
  0x3c   : > { %v414_v36 = vand.u32 %v593_v33, %v314_v19  ;;  %356 = vmatpush.bf16.msra.mxu1 %v348_v34  ;;  %p699_p1 = scmp.ne.s32.totalorder %s697_s29, %s698_s30  ;;  %p704_p5 = scmp.lt.s32.totalorder %s702_s7, %s698_s30 }
  0x3d   : > { %389 = vmatpush.bf16.msra.mxu2 %v381_v35 }
  0x3e   : > { %422 = vmatpush.bf16.msra.mxu3 %v414_v36  ;;  %p700_p2 = pnand %p699_p1, %p860_p8  ;;  %p705_p6 = por %p704_p5, %p703_p4 }
  0x3f   : > { %325 = vmatpush.bf16.msra.mxu0 %v600_v37 }
  0x40   : > { %357 = vmatpush.bf16.msra.mxu1 %v602_v38  ;;  %p701_p3 = pneg %p700_p2 }
  0x41   : > { %390 = vmatpush.bf16.msra.mxu2 %v604_v39 }
  0x42   : > { %423 = vmatpush.bf16.msra.mxu3 %v606_v40  ;;  %555 = vmatmul.msk.bf16.vlgmr.msra.gmra.mxu0 %vm307_vm2, %v291_v41  ;;  %p706_p7 = pnand %p705_p6, %p701_p3 }
  0x43   : > { %568 = vmatmul.msk.bf16.vlgmr.msra.gmra.mxu1 %vm307_vm2, %v291_v41 }
  0x44   : > { %581 = vmatmul.msk.bf16.vlgmr.msra.gmra.mxu2 %vm307_vm2, %v291_v41 }
  0x45   : > { %594 = vmatmul.msk.bf16.vlgmr.msra.gmra.mxu3 %vm307_vm2, %v291_v41 }
  0xa9   : > { %v434_v50 = vpop.permute.xlu0 %433 }
  0xbf   : > { %v327_v42 = vpop.f32.mrf.mxu0 }
  0xc0   : > { %v359_v43 = vpop.f32.mrf.mxu1 }
  0xc1   : > { %v363_v44 = vmax.f32 %v327_v42, %v359_v43 }
  0xc7   : > { %v392_v45 = vpop.f32.mrf.mxu2  ;;  %v329_v48 = vpop.f32.mrf.mxu0 }
  0xc8   : > { %v396_v46 = vmax.f32 %v363_v44, %v392_v45  ;;  %v425_v47 = vpop.f32.mrf.mxu3  ;;  %v361_v49 = vpop.f32.mrf.mxu1 }
  0xca   : > { %v429_v51 = vmax.f32 %v396_v46, %v425_v47 }
  0xcc   : > { %v436_v52 = vadd.f32 %v434_v50, %v429_v51 }
  0xce   : > { %v437_v53 = vmax.f32 %v436_v52, 0.0 }
  0xcf   : > { %v394_v54 = vpop.f32.mrf.mxu2 }
  0xd0   : > { %438 = vst [vmem:[%s289_s16] sm:$0xf] %v437_v53  ;;  %v427_v55 = vpop.f32.mrf.mxu3 }
  0xd1   : > { %709 = shalt.err (!%p706_p7)
}
  0xd2   : > { %608 = dma.vmem_to_hbm [thread:$0]  (%p860_p8), %s455_s25, 64, %s457_s28, %s440_s15  }
  0xd3 PF: > { %p614_p10 = scmp.ge.s32.totalorder %s776_s19, 2  ;;  %s468_s24 = sand.u32 1, %s748_s12  }
  0xd4   : > { %s469_s10 = scalar_lea.sflag [#allocation4], %s468_s24 }
  0xd5   : > { %p611_p11 = pnand %p614_p10, %p864_p9 }
  0xd7   : > { %p612_p12 = pneg %p611_p11 }
  0xd9   : > { %743 = dma.done.wait (%p612_p12), %s469_s10, 64  }
  0xda   : > { %745 = vsyncadd (%p612_p12), %s469_s10, 4294967232  ;;  %s16_s19 = sadd.s32 1, %s776_s19   ;;  %s965_s12 = smov %s752_s13 }
  0xdb   : > { %p13_p13 = scmp.ge.s32.totalorder %s16_s19, 6   ;;  %s966_s13 = smov %s756_s14 }
  0xdc   : > { %s967_s14 = smov %s872_s4  ;;  %s968_s15 = smov %s768_s17 }
  0xdd   : > { %s969_s16 = smov %s772_s18  ;;  %s970_s17 = smov %s973_s22 }
  0xde   : > { %s971_s18 = smov %s977_s23  ;;  %15 = sbr.rel (!%p13_p13) target bundleno = 5 (0x5), region = 116 }
  0xe3   :  { %475 = vsyncpa [#allocation4], 1 }
  0xe4   :  { %477 = vsyncpa [#allocation4 + $0x1], 1 }

</bundles_post_ra>
